<compile_context>
chip_gen: v7x
topology: tpu7x:2x2x1
jax: 0.10.0
libtpu: 0.0.40
codegen_flags: <defaults>
</compile_context>

<pallas_src>
import functools

import jax
import jax.numpy as jnp
from jax.experimental import pallas as pl
from jax.experimental.pallas import tpu as pltpu

BN_EPS = 1e-5


# ---------------------------------------------------------------------------
# Fused (2x nearest upsample + 3x3 conv) + per-tile BatchNorm partial stats.
# ---------------------------------------------------------------------------
def _upconv_kernel(x_ref, w_ref, y_ref, sum_ref, sq_ref, *, TH, W, K):
    # x_ref:   (1, H+2, W, 3*Cin)    column-expanded zero-padded low-res input (bf16),
    #                                VMEM-resident across the row-tile axis t.
    # w_ref:   (3, 3*Cin, 4*Cout)    folded weights (bf16); one matrix per row offset du.
    # y_ref:   (1, 1, TH*W, 4*Cout)  conv output for this row tile; lanes = (phase, Cout).
    # sum_ref: (1, 1, 1, 4*Cout)     per-(n, t) partial channel sums (f32).
    # sq_ref:  (1, 1, 1, 4*Cout)     per-(n, t) partial channel sum-of-squares (f32).
    t = pl.program_id(1)
    i0 = pl.multiple_of(t * TH, TH)

    def band(du):
        # Slice only the major (untiled) row dim of the resident block -> no relayout copies.
        return x_ref[0, pl.ds(i0 + du, TH), :, :].reshape(TH * W, K)

    # 3 matmuls (K = 3*Cin, N-lanes = 4*Cout), loop-carried f32 accumulation in vregs.
    y = jnp.dot(band(0), w_ref[0], preferred_element_type=jnp.float32)
    y = y + jnp.dot(band(1), w_ref[1], preferred_element_type=jnp.float32)
    y = y + jnp.dot(band(2), w_ref[2], preferred_element_type=jnp.float32)

    y_ref[0, 0] = y
    sum_ref[0, 0] = jnp.sum(y, axis=0, keepdims=True)
    sq_ref[0, 0] = jnp.sum(y * y, axis=0, keepdims=True)


@jax.jit
def up_conv_forward(x_nchw, w_oihw, bias, gamma, beta):
    """x_nchw: (N, Cin, H, W) f32.  Returns (N, Cout, 2H, 2W) f32."""
    del bias  # Exactly cancelled by train-mode BatchNorm mean subtraction (restore for eval-mode BN).
    N, Cin, H, W = x_nchw.shape
    Cout = w_oihw.shape[0]
    KX = 3 * Cin
    CO4 = 4 * Cout
    Hp = H + 2

    # Row tile: keep TH*W >= 256 (fills the 256-wide MXU on v6e/v7x) while capping the per-tile
    # f32 output block to ~2 MiB so larger images still fit scoped VMEM.
    TH = H
    while TH % 2 == 0 and (TH // 2) * W >= 256 and TH * W * CO4 * 4 > 2 * 1024 * 1024:
        TH //= 2
    n_t = H // TH

    # --- wrapper-side layout plumbing (cheap XLA, low-res only; no upsampled tensor in HBM) ---
    x_nhwc = jnp.transpose(x_nchw, (0, 2, 3, 1)).astype(jnp.float32)      # (N, H, W, Cin)
    x_pad = jnp.pad(x_nhwc, ((0, 0), (1, 1), (1, 1), (0, 0)))             # (N, H+2, W+2, Cin)
    # Three column-shifted variants concatenated along channels: every tap's column offset is a
    # lane offset, so the kernel never slices the sublane (W) dim.
    x_cols = jnp.concatenate([x_pad[:, :, dv:dv + W, :] for dv in range(3)], axis=-1)
    x_cols = x_cols.astype(jnp.bfloat16)                                  # (N, H+2, W, 3*Cin)

    # Fold the 3x3 kernel (post 2x nearest upsample) into 3 row-offset matrices whose output
    # lanes hold all 4 phases: w_all[du, dv*Cin + ci, (2a+b)*Cout + co].
    w_hwio = jnp.transpose(w_oihw, (2, 3, 1, 0)).astype(jnp.float32)      # (3, 3, Cin, Cout)
    w_all = jnp.zeros((3, 3, Cin, 4, Cout), jnp.float32)
    for a in (0, 1):
        for b in (0, 1):
            p = 2 * a + b
            for dh in range(3):
                du = (a + dh + 1) // 2
                for dw in range(3):
                    dv = (b + dw + 1) // 2
                    w_all = w_all.at[du, dv, :, p, :].add(w_hwio[dh, dw])
    w_all = w_all.reshape(3, KX, CO4).astype(jnp.bfloat16)

    kernel = functools.partial(_upconv_kernel, TH=TH, W=W, K=KX)

    y, psum, psq = pl.pallas_call(
        kernel,
        out_shape=(
            jax.ShapeDtypeStruct((N, n_t, TH * W, CO4), jnp.float32),
            jax.ShapeDtypeStruct((N, n_t, 1, CO4), jnp.float32),
            jax.ShapeDtypeStruct((N, n_t, 1, CO4), jnp.float32),
        ),
        grid_spec=pltpu.PrefetchScalarGridSpec(
            num_scalar_prefetch=0,
            grid=(N, n_t),
            in_specs=[
                # Whole padded low-res image per batch element (tiny at real Cin); constant over
                # t, so DMA'd once per n and resident across the row tiles.
                # TODO(synk): for very large H*W*Cin switch to a row-haloed (TH+2)-band block.
                pl.BlockSpec((1, Hp, W, KX), lambda n, t: (n, 0, 0, 0)),
                pl.BlockSpec((3, KX, CO4), lambda n, t: (0, 0, 0)),
            ],
            out_specs=(
                pl.BlockSpec((1, 1, TH * W, CO4), lambda n, t: (n, t, 0, 0)),
                pl.BlockSpec((1, 1, 1, CO4), lambda n, t: (n, t, 0, 0)),
                pl.BlockSpec((1, 1, 1, CO4), lambda n, t: (n, t, 0, 0)),
            ),
        ),
        compiler_params=pltpu.CompilerParams(
            dimension_semantics=("parallel", "parallel"),
            vmem_limit_bytes=32 * 1024 * 1024,
        ),
    )(x_cols, w_all)

    # --- train-mode BatchNorm folded into one scale/shift; fused by XLA into the epilogue ---
    count = float(N * 4 * H * W)                                   # N * 2H * 2W pixels / channel
    tot_s = jnp.sum(psum, axis=(0, 1)).reshape(4, Cout).sum(axis=0)
    tot_q = jnp.sum(psq, axis=(0, 1)).reshape(4, Cout).sum(axis=0)
    mean = tot_s / count
    var = jnp.maximum(tot_q / count - mean * mean, 0.0)
    inv = jax.lax.rsqrt(var + BN_EPS)
    scale = gamma.astype(jnp.float32) * inv
    shift = beta.astype(jnp.float32) - mean * scale
    scale4 = jnp.tile(scale, 4)
    shift4 = jnp.tile(shift, 4)

    # scale/shift + ReLU + phase interleave in one fused XLA epilogue (single read of y).
    z = jnp.maximum(y * scale4 + shift4, 0.0)                      # (N, n_t, TH*W, 4*Cout)
    z = z.reshape(N, n_t, TH, W, 2, 2, Cout)                       # (n, t, th, j, a, b, o)
    z = jnp.transpose(z, (0, 6, 1, 2, 4, 3, 5))                    # (n, o, t, th, a, j, b)
    return z.reshape(N, Cout, 2 * H, 2 * W)


def reference_forward(x_nchw, w_oihw, bias, gamma, beta):
    """Pure-JAX f32 reference of the PyTorch forward (train-mode BatchNorm)."""
    xu = jnp.repeat(jnp.repeat(x_nchw, 2, axis=2), 2, axis=3)
    y = jax.lax.conv_general_dilated(
        xu, w_oihw, window_strides=(1, 1), padding=((1, 1), (1, 1)),
        dimension_numbers=("NCHW", "OIHW", "NCHW"),
    )
    y = y + bias[None, :, None, None]
    mean = jnp.mean(y, axis=(0, 2, 3), keepdims=True)
    var = jnp.mean((y - mean) ** 2, axis=(0, 2, 3), keepdims=True)
    y = (y - mean) * jax.lax.rsqrt(var + BN_EPS)
    y = y * gamma[None, :, None, None] + beta[None, :, None, None]
    return jnp.maximum(y, 0.0)


if __name__ == "__main__":
    # Small shapes consistent with the module: N=2, in_ch=4, out_ch=8, 16x16 spatial.
    N, in_ch, out_ch, H, W = 2, 4, 8, 16, 16

    key = jax.random.PRNGKey(0)
    kx, kw, kb = jax.random.split(key, 3)

    x = jax.random.normal(kx, (N, in_ch, H, W), dtype=jnp.float32)
    w_oihw = 0.1 * jax.random.normal(kw, (out_ch, in_ch, 3, 3), dtype=jnp.float32)
    bias = 0.1 * jax.random.normal(kb, (out_ch,), dtype=jnp.float32)
    # BatchNorm2d default init: gamma=1, beta=0.
    gamma = jnp.ones((out_ch,), dtype=jnp.float32)
    beta = jnp.zeros((out_ch,), dtype=jnp.float32)

    out = up_conv_forward(x, w_oihw, bias, gamma, beta)
    out = jax.block_until_ready(out)

    ref = reference_forward(x, w_oihw, bias, gamma, beta)
    assert out.shape == (N, out_ch, 2 * H, 2 * W), out.shape
    max_err = float(jnp.max(jnp.abs(out - ref)))
    # bf16 matmul operands with f32 accumulation vs. the f32 reference -> 2e-2 gate.
    assert jnp.allclose(out, ref, atol=2e-2, rtol=2e-2), max_err

    print("KERNEL_OK")
</pallas_src>

<mosaic_0001>
module attributes {stable_mosaic.version = 11 : i64} {
  func.func @_upconv_kernel(%arg0: i32, %arg1: i32, %arg2: memref<1x18x16x12xbf16, #tpu.memory_space<vmem>>, %arg3: memref<3x12x32xbf16, #tpu.memory_space<vmem>>, %arg4: memref<1x1x256x32xf32, #tpu.memory_space<vmem>>, %arg5: memref<1x1x1x32xf32, #tpu.memory_space<vmem>>, %arg6: memref<1x1x1x32xf32, #tpu.memory_space<vmem>>) attributes {dimension_semantics = [#tpu.dimension_semantics<parallel>, #tpu.dimension_semantics<parallel>], iteration_bounds = array<i64: 2, 1>, scalar_prefetch = 0 : i64, scratch_operands = 0 : i64, tpu.core_type = #tpu.core_type<tc>, window_params = [{transform_indices = @transform_0, window_bounds = array<i64: 1, 18, 16, 12>}, {pipeline_mode = #tpu.pipeline_mode<synchronous>, transform_indices = @transform_1, window_bounds = array<i64: 3, 12, 32>}, {transform_indices = @transform_2, window_bounds = array<i64: 1, 1, 256, 32>}, {transform_indices = @transform_3, window_bounds = array<i64: 1, 1, 1, 32>}, {transform_indices = @transform_4, window_bounds = array<i64: 1, 1, 1, 32>}]} {
    %c16_i32 = arith.constant 16 : i32
    %0 = arith.muli %arg1, %c16_i32 : i32
    %1 = tpu.assume_multiple %0, 16 : i32
    %c0_i32 = arith.constant 0 : i32
    %2 = arith.addi %1, %c0_i32 : i32
    %c0 = arith.constant 0 : index
    %3 = arith.index_cast %2 : i32 to index
    %c0_0 = arith.constant 0 : index
    %c0_1 = arith.constant 0 : index
    %4 = vector.load %arg2[%c0, %3, %c0_0, %c0_1] : memref<1x18x16x12xbf16, #tpu.memory_space<vmem>>, vector<1x16x16x12xbf16>
    %5 = vector.shape_cast %4 : vector<1x16x16x12xbf16> to vector<16x16x12xbf16>
    %6 = vector.shape_cast %5 : vector<16x16x12xbf16> to vector<256x12xbf16>
    %c0_2 = arith.constant 0 : index
    %c0_3 = arith.constant 0 : index
    %c0_4 = arith.constant 0 : index
    %7 = vector.load %arg3[%c0_2, %c0_3, %c0_4] : memref<3x12x32xbf16, #tpu.memory_space<vmem>>, vector<1x12x32xbf16>
    %8 = vector.shape_cast %7 : vector<1x12x32xbf16> to vector<12x32xbf16>
    %cst = arith.constant dense<0.000000e+00> : vector<256x32xf32>
    %9 = tpu.matmul %6, %8, %cst {dimension_numbers = #tpu.dot_dimension_numbers<[1], [0], [0], [1], [0, 0, 1, 1], [], []>} : vector<256x12xbf16>, vector<12x32xbf16>, vector<256x32xf32> -> vector<256x32xf32>
    %c1_i32 = arith.constant 1 : i32
    %10 = arith.addi %1, %c1_i32 : i32
    %c0_5 = arith.constant 0 : index
    %11 = arith.index_cast %10 : i32 to index
    %c0_6 = arith.constant 0 : index
    %c0_7 = arith.constant 0 : index
    %12 = vector.load %arg2[%c0_5, %11, %c0_6, %c0_7] : memref<1x18x16x12xbf16, #tpu.memory_space<vmem>>, vector<1x16x16x12xbf16>
    %13 = vector.shape_cast %12 : vector<1x16x16x12xbf16> to vector<16x16x12xbf16>
    %14 = vector.shape_cast %13 : vector<16x16x12xbf16> to vector<256x12xbf16>
    %c1 = arith.constant 1 : index
    %c0_8 = arith.constant 0 : index
    %c0_9 = arith.constant 0 : index
    %15 = vector.load %arg3[%c1, %c0_8, %c0_9] : memref<3x12x32xbf16, #tpu.memory_space<vmem>>, vector<1x12x32xbf16>
    %16 = vector.shape_cast %15 : vector<1x12x32xbf16> to vector<12x32xbf16>
    %cst_10 = arith.constant dense<0.000000e+00> : vector<256x32xf32>
    %17 = tpu.matmul %14, %16, %cst_10 {dimension_numbers = #tpu.dot_dimension_numbers<[1], [0], [0], [1], [0, 0, 1, 1], [], []>} : vector<256x12xbf16>, vector<12x32xbf16>, vector<256x32xf32> -> vector<256x32xf32>
    %18 = arith.addf %9, %17 : vector<256x32xf32>
    %c2_i32 = arith.constant 2 : i32
    %19 = arith.addi %1, %c2_i32 : i32
    %c0_11 = arith.constant 0 : index
    %20 = arith.index_cast %19 : i32 to index
    %c0_12 = arith.constant 0 : index
    %c0_13 = arith.constant 0 : index
    %21 = vector.load %arg2[%c0_11, %20, %c0_12, %c0_13] : memref<1x18x16x12xbf16, #tpu.memory_space<vmem>>, vector<1x16x16x12xbf16>
    %22 = vector.shape_cast %21 : vector<1x16x16x12xbf16> to vector<16x16x12xbf16>
    %23 = vector.shape_cast %22 : vector<16x16x12xbf16> to vector<256x12xbf16>
    %c2 = arith.constant 2 : index
    %c0_14 = arith.constant 0 : index
    %c0_15 = arith.constant 0 : index
    %24 = vector.load %arg3[%c2, %c0_14, %c0_15] : memref<3x12x32xbf16, #tpu.memory_space<vmem>>, vector<1x12x32xbf16>
    %25 = vector.shape_cast %24 : vector<1x12x32xbf16> to vector<12x32xbf16>
    %cst_16 = arith.constant dense<0.000000e+00> : vector<256x32xf32>
    %26 = tpu.matmul %23, %25, %cst_16 {dimension_numbers = #tpu.dot_dimension_numbers<[1], [0], [0], [1], [0, 0, 1, 1], [], []>} : vector<256x12xbf16>, vector<12x32xbf16>, vector<256x32xf32> -> vector<256x32xf32>
    %27 = arith.addf %18, %26 : vector<256x32xf32>
    %c0_17 = arith.constant 0 : index
    %c0_18 = arith.constant 0 : index
    %c0_19 = arith.constant 0 : index
    %c0_20 = arith.constant 0 : index
    %28 = vector.load %arg4[%c0_17, %c0_18, %c0_19, %c0_20] : memref<1x1x256x32xf32, #tpu.memory_space<vmem>>, vector<1x1x256x32xf32>
    %29 = vector.shape_cast %28 : vector<1x1x256x32xf32> to vector<256x32xf32>
    %30 = vector.shape_cast %27 : vector<256x32xf32> to vector<1x1x256x32xf32>
    tpu.vector_store %arg4[%c0_17, %c0_18, %c0_19, %c0_20], %30 {strides = array<i32>} : memref<1x1x256x32xf32, #tpu.memory_space<vmem>>, vector<1x1x256x32xf32>,
    %cst_21 = arith.constant dense<0.000000e+00> : vector<32xf32>
    %31 = vector.multi_reduction <add>, %27, %cst_21 [0] : vector<256x32xf32> to vector<32xf32>
    %32 = vector.shape_cast %31 : vector<32xf32> to vector<1x32xf32>
    %c0_22 = arith.constant 0 : index
    %c0_23 = arith.constant 0 : index
    %c0_24 = arith.constant 0 : index
    %c0_25 = arith.constant 0 : index
    %33 = vector.load %arg5[%c0_22, %c0_23, %c0_24, %c0_25] : memref<1x1x1x32xf32, #tpu.memory_space<vmem>>, vector<1x1x1x32xf32>
    %34 = vector.shape_cast %33 : vector<1x1x1x32xf32> to vector<1x32xf32>
    %35 = vector.shape_cast %32 : vector<1x32xf32> to vector<1x1x1x32xf32>
    tpu.vector_store %arg5[%c0_22, %c0_23, %c0_24, %c0_25], %35 {strides = array<i32>} : memref<1x1x1x32xf32, #tpu.memory_space<vmem>>, vector<1x1x1x32xf32>,
    %36 = arith.mulf %27, %27 : vector<256x32xf32>
    %cst_26 = arith.constant dense<0.000000e+00> : vector<32xf32>
    %37 = vector.multi_reduction <add>, %36, %cst_26 [0] : vector<256x32xf32> to vector<32xf32>
    %38 = vector.shape_cast %37 : vector<32xf32> to vector<1x32xf32>
    %c0_27 = arith.constant 0 : index
    %c0_28 = arith.constant 0 : index
    %c0_29 = arith.constant 0 : index
    %c0_30 = arith.constant 0 : index
    %39 = vector.load %arg6[%c0_27, %c0_28, %c0_29, %c0_30] : memref<1x1x1x32xf32, #tpu.memory_space<vmem>>, vector<1x1x1x32xf32>
    %40 = vector.shape_cast %39 : vector<1x1x1x32xf32> to vector<1x32xf32>
    %41 = vector.shape_cast %38 : vector<1x32xf32> to vector<1x1x1x32xf32>
    tpu.vector_store %arg6[%c0_27, %c0_28, %c0_29, %c0_30], %41 {strides = array<i32>} : memref<1x1x1x32xf32, #tpu.memory_space<vmem>>, vector<1x1x1x32xf32>,
    return
  }
  func.func @transform_0(%arg0: i32, %arg1: i32) -> (i32, i32, i32, i32) {
    %c0_i32 = arith.constant 0 : i32
    %c0_i32_0 = arith.constant 0 : i32
    %c0_i32_1 = arith.constant 0 : i32
    %c0_i32_2 = arith.constant 0 : i32
    return %arg0, %c0_i32, %c0_i32_0, %c0_i32_1 : i32, i32, i32, i32
  }
  func.func @transform_1(%arg0: i32, %arg1: i32) -> (i32, i32, i32) {
    %c0_i32 = arith.constant 0 : i32
    %c0_i32_0 = arith.constant 0 : i32
    %c0_i32_1 = arith.constant 0 : i32
    %c0_i32_2 = arith.constant 0 : i32
    return %c0_i32, %c0_i32_0, %c0_i32_1 : i32, i32, i32
  }
  func.func @transform_2(%arg0: i32, %arg1: i32) -> (i32, i32, i32, i32) {
    %c0_i32 = arith.constant 0 : i32
    %c0_i32_0 = arith.constant 0 : i32
    %c0_i32_1 = arith.constant 0 : i32
    return %arg0, %arg1, %c0_i32, %c0_i32_0 : i32, i32, i32, i32
  }
  func.func @transform_3(%arg0: i32, %arg1: i32) -> (i32, i32, i32, i32) {
    %c0_i32 = arith.constant 0 : i32
    %c0_i32_0 = arith.constant 0 : i32
    %c0_i32_1 = arith.constant 0 : i32
    return %arg0, %arg1, %c0_i32, %c0_i32_0 : i32, i32, i32, i32
  }
  func.func @transform_4(%arg0: i32, %arg1: i32) -> (i32, i32, i32, i32) {
    %c0_i32 = arith.constant 0 : i32
    %c0_i32_0 = arith.constant 0 : i32
    %c0_i32_1 = arith.constant 0 : i32
    return %arg0, %arg1, %c0_i32, %c0_i32_0 : i32, i32, i32, i32
  }
}

</mosaic_0001>

<bundles_post_ra>
// kernel: tile.17
= control target key start
LH: loop header
LB: loop body
LE: loop exit
PB: predicated region body
PF: predicated region fallthrough
CT: control target
= control target key end

     0   :  { %s22_s0 = inlined_call_operand.vmem [shape: f32[8], index: 0, kind: input, shape index: {}]   ;;  %s23_s1 = inlined_call_operand.vmem [shape: f32[4,8], index: 1, kind: output, shape index: {}]  }
   0x1   :  { %v4_v0 = vld [vmem:[%s22_s0] ss:$0 sm:$0xff] }
   0x2   :  { %5 = vst [vmem:[%s23_s1] sm:$0xf] %v4_v0 }

// kernel: up_conv_forward.1
= control target key start
LH: loop header
LB: loop body
LE: loop exit
PB: predicated region body
PF: predicated region fallthrough
CT: control target
= control target key end

     0   :  { %s2190_s15 = smov 0   ;;  %s2192_s16 = smov 0   ;;  %s2503_s0 = inlined_call_operand.vmem [shape: bf16[2,18,16,12], index: 0, kind: input, shape index: {}]   ;;  %s2504_s1 = inlined_call_operand.vmem [shape: bf16[3,12,32], index: 1, kind: input, shape index: {}]   ;;  %s2505_s2 = inlined_call_operand.vmem [shape: f32[2,1,256,32], index: 2, kind: output, shape index: {0}]   ;;  %s2506_s3 = inlined_call_operand.vmem [shape: f32[2,1,1,32], index: 3, kind: output, shape index: {1}]   ;;  %s2507_s4 = inlined_call_operand.vmem [shape: f32[2,1,1,32], index: 4, kind: output, shape index: {2}]  }
   0x1   :  { %s2194_s17 = smov 0  }
   0x2 LB: > { %s27_s18 = sadd.s32 1, %s2159_s16  ;;  %p1668_p0 = scmp.ge.s32.totalorder %s2163_s17, 1  ;;  %s2163_s17 = sphi %s2194_s17, %s15_s17   ;;  %s2159_s16 = sphi %s2192_s16, %s2509_s16   ;;  %s2155_s15 = sphi %s2190_s15, %s2508_s15  }
   0x3   : > { %p29_p1 = scmp.ge.s32.totalorder %s27_s18, 2  ;;  %p185_p2 = scmp.lt.s32.totalorder %s2163_s17, 3 }
   0x5   : > { %s2511_s18 = smov (%p29_p1, %s27_s18), 0  ;;  %p186_p3 = pnand %p1668_p0, %p185_p2 }
   0x6   : > { %v2090_v0 = vld [vmem:[%s2504_s1 + $0x8] sm:$0x3f] (!%p186_p3)   ;;  %vm465_vm0 = vcmask (!%p186_p3), 1045504   ;;  %p227_p4 = scmp.lt.s32.totalorder (!%p186_p3), %s2155_s15, 1  ;;  %v2091_v1 = vld [vmem:[%s2504_s1] sm:$0x3f] (!%p186_p3)  }
   0x7   : > { %189 = sbr.rel (%p186_p3) target bundleno = 347 (0x15b), region = 28  ;;  %2061 = vmatprep.subr.msk.bf16.mxu1 (!%p186_p3), %vm465_vm0, %v2090_v0  ;;  %v467_v2 = vsel (!%p186_p3), %vm465_vm0, %v2090_v0, 0  ;;  %v2094_v3 = vld [vmem:[%s2504_s1 + $0x10] sm:$0x3f] (!%p186_p3)   ;;  %2062 = vmatprep.subr.msk.bf16.mxu0 (!%p186_p3), %vm465_vm0, %v2091_v1  ;;  %v764_v4 = vsel (!%p186_p3), %vm465_vm0, %v2091_v1, 0  ;;  %vm416_vm1 = vcmask (!%p186_p3), 97280  }
   0x8   : > { %1894 = vmatpush3.bf16.msra.mxu1 (!%p186_p3), %v467_v2  ;;  %1928 = vmatpush3.bf16.msra.mxu0 (!%p186_p3), %v764_v4  ;;  %v1100_v9 = vsel (!%p186_p3), %vm465_vm0, %v2094_v3, 0  ;;  %vm1295_vm2 = vcmask (!%p186_p3), 261120   ;;  %vm1397_vm3 = vcmask (!%p186_p3), 253952  }
   0x9   : > { %2063 = vmatprep.subr.msk.bf16.mxu1 (!%p186_p3), %vm465_vm0, %v2091_v1  ;;  %2064 = vmatprep.subr.msk.bf16.mxu0 (!%p186_p3), %vm465_vm0, %v2094_v3 }
   0xe   : > { %s2513_s15 = smov (!%p227_p4, %s2155_s15), 1 }
   0xf   : > { %s2065_s25 = smul.u32 144, %s2513_s15  ;;  %s1841_s29 = sshll.u32 %s2513_s15, 8 }
  0x10   : > { %s2348_s6 = scalar_lea.vmem %s2505_s2, %s1841_s29  ;;  %s246_s9 = scalar_lea.vmem %s2506_s3, %s2513_s15 }
  0x11   : > { %s2229_s28 = scalar_lea.vmem %s2503_s0, %s2065_s25  ;;  %s252_s12 = scalar_lea.vmem %s2507_s4, %s2513_s15 }
  0x12   : > { %v2092_v5 = vld [vmem:[%s2229_s28 + $0x8] sm:$0xff]   ;;  %v2093_v6 = vld [vmem:[%s2229_s28] sm:$0xff]   ;;  %v2095_v7 = vld [vmem:[%s2229_s28 + $0x10] sm:$0xff]  }
  0x13   : > { %1895 = vmatprep.mubr.msk.bf16.mxu1 %vm416_vm1, %v2092_v5  ;;  %1929 = vmatprep.mubr.msk.bf16.mxu0 %vm416_vm1, %v2093_v6  ;;  %v2096_v8 = vld [vmem:[%s2229_s28 + $0x8] sm:$0xff]   ;;  %v2097_v10 = vld [vmem:[%s2229_s28 + $0x18] sm:$0xff]   ;;  %v2098_v11 = vld [vmem:[%s2229_s28 + $0x10] sm:$0xff]  }
  0x14   : > { %1896 = vmatmul.mubr.msk.bf16.vlgmr.msra.gmra.mrb[0].mxu1 %vm416_vm1, %v2095_v7  ;;  %1930 = vmatmul.mubr.msk.bf16.vlgmr.msra.gmra.mrb[0].mxu0 %vm416_vm1, %v2096_v8  ;;  %v2099_v12 = vld [vmem:[%s2229_s28 + $0x20] sm:$0xff]   ;;  %v2100_v13 = vld [vmem:[%s2229_s28 + $0x18] sm:$0xff]   ;;  %v2101_v14 = vld [vmem:[%s2229_s28 + $0x28] sm:$0xff]  }
  0x15   : > { %1996 = vmatpush3.bf16.msra.mxu1 %v764_v4  ;;  %1962 = vmatpush3.bf16.msra.mxu0 %v1100_v9  ;;  %v2102_v15 = vld [vmem:[%s2229_s28 + $0x20] sm:$0xff]   ;;  %v2103_v16 = vld [vmem:[%s2229_s28 + $0x30] sm:$0xff]   ;;  %v2104_v17 = vld [vmem:[%s2229_s28 + $0x28] sm:$0xff]  }
  0x16   : > { %1899 = vmatprep.mubr.msk.bf16.mxu1 %vm416_vm1, %v2097_v10  ;;  %1933 = vmatprep.mubr.msk.bf16.mxu0 %vm416_vm1, %v2098_v11  ;;  %v2105_v18 = vld [vmem:[%s2229_s28 + $0x38] sm:$0xff]   ;;  %v2106_v19 = vld [vmem:[%s2229_s28 + $0x30] sm:$0xff]   ;;  %v2107_v20 = vld [vmem:[%s2229_s28 + $0x40] sm:$0xff]  }
  0x17   : > { %v2108_v21 = vld [vmem:[%s2229_s28 + $0x38] sm:$0xff]   ;;  %v2109_v22 = vld [vmem:[%s2229_s28 + $0x48] sm:$0xff]   ;;  %v2110_v23 = vld [vmem:[%s2229_s28 + $0x10] sm:$0xff]  }
  0x18   : > { %v2111_v24 = vld [vmem:[%s2229_s28 + $0x50] sm:$0xff]   ;;  %v2112_v25 = vld [vmem:[%s2229_s28 + $0x18] sm:$0xff]   ;;  %v2114_v27 = vld [vmem:[%s2229_s28 + $0x20] sm:$0xff]  }
  0x19   : > { %v2113_v26 = vld [vmem:[%s2229_s28 + $0x58] sm:$0xff]   ;;  %v2115_v28 = vld [vmem:[%s2229_s28 + $0x60] sm:$0xff]   ;;  %v2116_v29 = vld [vmem:[%s2229_s28 + $0x28] sm:$0xff]  }
  0x1a   : > { %v2117_v30 = vld [vmem:[%s2229_s28 + $0x68] sm:$0xff]   ;;  %v2118_v31 = vld [vmem:[%s2229_s28 + $0x30] sm:$0xff]   ;;  %v2120_v33 = vld [vmem:[%s2229_s28 + $0x38] sm:$0xff]  }
  0x1b   : > { %v2119_v32 = vld [vmem:[%s2229_s28 + $0x70] sm:$0xff]   ;;  %v2121_v34 = vld [vmem:[%s2229_s28 + $0x78] sm:$0xff]   ;;  %v2122_v35 = vld [vmem:[%s2229_s28 + $0x40] sm:$0xff]  }
  0x1c   : > { %1900 = vmatmul.mubr.msk.bf16.gmra.mrb[4].mxu1 %vm416_vm1, %v2099_v12  ;;  %1934 = vmatmul.mubr.msk.bf16.gmra.mrb[4].mxu0 %vm416_vm1, %v2100_v13  ;;  %v2123_v36 = vld [vmem:[%s2229_s28 + $0x80] sm:$0xff]   ;;  %v2124_v37 = vld [vmem:[%s2229_s28 + $0x48] sm:$0xff]   ;;  %v2126_v39 = vld [vmem:[%s2229_s28 + $0x50] sm:$0xff]  }
  0x1d   : > { %1903 = vmatprep.mubr.msk.bf16.mxu1 %vm416_vm1, %v2101_v14  ;;  %1937 = vmatprep.mubr.msk.bf16.mxu0 %vm416_vm1, %v2102_v15  ;;  %v2125_v38 = vld [vmem:[%s2229_s28 + $0x40] sm:$0xff]   ;;  %v2127_v40 = vld [vmem:[%s2229_s28 + $0x48] sm:$0xff]   ;;  %v2128_v41 = vld [vmem:[%s2229_s28 + $0x58] sm:$0xff]  }
  0x1e   : > { %v2129_v42 = vld [vmem:[%s2229_s28 + $0x50] sm:$0xff]   ;;  %v2130_v43 = vld [vmem:[%s2229_s28 + $0x60] sm:$0xff]   ;;  %v2131_v44 = vld [vmem:[%s2229_s28 + $0x58] sm:$0xff]  }
  0x1f   : > { %v2132_v45 = vld [vmem:[%s2229_s28 + $0x68] sm:$0xff]   ;;  %v2133_v46 = vld [vmem:[%s2229_s28 + $0x60] sm:$0xff]   ;;  %v2134_v47 = vld [vmem:[%s2229_s28 + $0x70] sm:$0xff]  }
  0x20   : > { %v2135_v48 = vld [vmem:[%s2229_s28 + $0x68] sm:$0xff]   ;;  %v2136_v49 = vld [vmem:[%s2229_s28 + $0x78] sm:$0xff]   ;;  %v2137_v50 = vld [vmem:[%s2229_s28 + $0x70] sm:$0xff]  }
  0x21   : > { %v2138_v51 = vld [vmem:[%s2229_s28 + $0x80] sm:$0xff]   ;;  %v2139_v52 = vld [vmem:[%s2229_s28 + $0x78] sm:$0xff]   ;;  %v2140_v53 = vld [vmem:[%s2229_s28 + $0x88] sm:$0xff]  }
  0x24   : > { %1904 = vmatmul.mubr.msk.bf16.gmra.mrb[8].mxu1 %vm416_vm1, %v2103_v16  ;;  %1938 = vmatmul.mubr.msk.bf16.gmra.mrb[8].mxu0 %vm416_vm1, %v2104_v17 }
  0x25   : > { %1907 = vmatprep.mubr.msk.bf16.mxu1 %vm416_vm1, %v2105_v18  ;;  %1941 = vmatprep.mubr.msk.bf16.mxu0 %vm416_vm1, %v2106_v19 }
  0x2c   : > { %1908 = vmatmul.mubr.msk.bf16.gmra.mrb[12].mxu1 %vm416_vm1, %v2107_v20  ;;  %1942 = vmatmul.mubr.msk.bf16.gmra.mrb[12].mxu0 %vm416_vm1, %v2108_v21 }
  0x2d   : > { %1911 = vmatprep.mubr.msk.bf16.mxu1 %vm416_vm1, %v2109_v22  ;;  %1963 = vmatprep.mubr.msk.bf16.mxu0 %vm416_vm1, %v2110_v23 }
  0x34   : > { %1912 = vmatmul.mubr.msk.bf16.gmra.mrb[16].mxu1 %vm416_vm1, %v2111_v24  ;;  %1964 = vmatmul.mubr.msk.bf16.vlgmr.msra.gmra.mrb[0].mxu0 %vm416_vm1, %v2112_v25 }
  0x35   : > { %1915 = vmatprep.mubr.msk.bf16.mxu1 %vm416_vm1, %v2113_v26  ;;  %1967 = vmatprep.mubr.msk.bf16.mxu0 %vm416_vm1, %v2114_v27 }
  0x3c   : > { %1916 = vmatmul.mubr.msk.bf16.gmra.mrb[20].mxu1 %vm416_vm1, %v2115_v28  ;;  %1968 = vmatmul.mubr.msk.bf16.gmra.mrb[4].mxu0 %vm416_vm1, %v2116_v29 }
  0x3d   : > { %1919 = vmatprep.mubr.msk.bf16.mxu1 %vm416_vm1, %v2117_v30  ;;  %1971 = vmatprep.mubr.msk.bf16.mxu0 %vm416_vm1, %v2118_v31 }
  0x44   : > { %1920 = vmatmul.mubr.msk.bf16.gmra.mrb[24].mxu1 %vm416_vm1, %v2119_v32  ;;  %1972 = vmatmul.mubr.msk.bf16.gmra.mrb[8].mxu0 %vm416_vm1, %v2120_v33 }
  0x45   : > { %1923 = vmatprep.mubr.msk.bf16.mxu1 %vm416_vm1, %v2121_v34  ;;  %1975 = vmatprep.mubr.msk.bf16.mxu0 %vm416_vm1, %v2122_v35 }
  0x4c   : > { %1924 = vmatmul.mubr.msk.bf16.gmra.mrb[28].mxu1 %vm416_vm1, %v2123_v36  ;;  %1976 = vmatmul.mubr.msk.bf16.gmra.mrb[12].mxu0 %vm416_vm1, %v2124_v37 }
  0x4d   : > { %1945 = vmatprep.mubr.msk.bf16.mxu1 %vm416_vm1, %v2125_v38  ;;  %1979 = vmatprep.mubr.msk.bf16.mxu0 %vm416_vm1, %v2126_v39 }
  0x54   : > { %1946 = vmatmul.mubr.msk.bf16.vlgmr.msra.gmra.mrb[16].mxu1 %vm416_vm1, %v2127_v40  ;;  %1980 = vmatmul.mubr.msk.bf16.gmra.mrb[16].mxu0 %vm416_vm1, %v2128_v41 }
  0x55   : > { %1949 = vmatprep.mubr.msk.bf16.mxu1 %vm416_vm1, %v2129_v42  ;;  %1983 = vmatprep.mubr.msk.bf16.mxu0 %vm416_vm1, %v2130_v43 }
  0x5c   : > { %1950 = vmatmul.mubr.msk.bf16.gmra.mrb[20].mxu1 %vm416_vm1, %v2131_v44  ;;  %1984 = vmatmul.mubr.msk.bf16.gmra.mrb[20].mxu0 %vm416_vm1, %v2132_v45 }
  0x5d   : > { %1953 = vmatprep.mubr.msk.bf16.mxu1 %vm416_vm1, %v2133_v46  ;;  %1987 = vmatprep.mubr.msk.bf16.mxu0 %vm416_vm1, %v2134_v47 }
  0x64   : > { %1954 = vmatmul.mubr.msk.bf16.gmra.mrb[24].mxu1 %vm416_vm1, %v2135_v48  ;;  %1988 = vmatmul.mubr.msk.bf16.gmra.mrb[24].mxu0 %vm416_vm1, %v2136_v49 }
  0x65   : > { %1957 = vmatprep.mubr.msk.bf16.mxu1 %vm416_vm1, %v2137_v50  ;;  %1991 = vmatprep.mubr.msk.bf16.mxu0 %vm416_vm1, %v2138_v51 }
  0x6c   : > { %1958 = vmatmul.mubr.msk.bf16.gmra.mrb[28].mxu1 %vm416_vm1, %v2139_v52  ;;  %1992 = vmatmul.mubr.msk.bf16.gmra.mrb[28].mxu0 %vm416_vm1, %v2140_v53 }
  0xe7   : > { %v1897_v54 = vpop.f32.mrb[0].mxu1 }
  0xe8   : > { %v503_v55 = vpop.f32.mrb[1].mxu1 }
  0xe9   : > { %v1898_v56 = vpop.f32.mrb[2].mxu1 }
  0xea   : > { %v506_v57 = vpop.f32.mrb[3].mxu1 }
  0xef   : > { %v1901_v58 = vpop.f32.mrb[4].mxu1 }
  0xf0   : > { %v519_v59 = vpop.f32.mrb[5].mxu1 }
  0xf1   : > { %v1902_v60 = vpop.f32.mrb[6].mxu1 }
  0xf2   : > { %v522_v61 = vpop.f32.mrb[7].mxu1 }
  0xf7   : > { %v2328_v62 = vpop.f32.mrb[8].mxu1 }
  0xf8   : > { %v2330_v63 = vpop.f32.mrb[9].mxu1 }
  0xf9   : > { %v2332_v0 = vpop.f32.mrb[10].mxu1 }
  0xfa   : > { %v2334_v1 = vpop.f32.mrb[11].mxu1 }
  0xff   : > { %v2336_v2 = vpop.f32.mrb[12].mxu1 }
 0x100   : > { %v2338_v3 = vpop.f32.mrb[13].mxu1 }
 0x101   : > { %v2340_v4 = vpop.f32.mrb[14].mxu1 }
 0x102   : > { %v2342_v5 = vpop.f32.mrb[15].mxu1 }
 0x107   : > { %v1965_v6 = vpop.f32.mrb[0].mxu0 }
 0x108   : > { %v1997_v7 = vadd.f32 %v1965_v6, %v1897_v54  ;;  %v1136_v8 = vpop.f32.mrb[1].mxu0 }
 0x109   : > { %v1998_v9 = vadd.f32 %v1136_v8, %v503_v55  ;;  %v1966_v10 = vpop.f32.mrb[2].mxu0 }
 0x10a   : > { %1298 = vst.msk [vmem:[%s2348_s6 + $0x10] sm:$0xff] %vm1295_vm2, %v1997_v7  ;;  %v1999_v11 = vadd.f32 %v1966_v10, %v1898_v56  ;;  %v1139_v12 = vpop.f32.mrb[3].mxu0  ;;  %v1401_v15 = vmul.f32 %v1997_v7, %v1997_v7  ;;  %v1331_v21 = vsel %vm1295_vm2, %v1997_v7, 0.0 }
 0x10b   : > { %1296 = vst.msk [vmem:[%s2348_s6] sm:$0xff] %vm1295_vm2, %v1998_v9  ;;  %v1399_v13 = vmul.f32 %v1998_v9, %v1998_v9  ;;  %v2000_v14 = vadd.f32 %v1139_v12, %v506_v57  ;;  %v1328_v16 = vsel %vm1295_vm2, %v1998_v9, 0.0 }
 0x10c   : > { %1299 = vst.msk [vmem:[%s2348_s6 + $0x18] sm:$0xff] %vm1295_vm2, %v1999_v11  ;;  %v1402_v19 = vmul.f32 %v1999_v11, %v1999_v11  ;;  %v1434_v29 = vsel %vm1295_vm2, %v1401_v15, 0.0  ;;  %v1333_v30 = vsel %vm1295_vm2, %v1999_v11, 0.0 }
 0x10d   : > { %1297 = vst.msk [vmem:[%s2348_s6 + $0x8] sm:$0xff] %vm1295_vm2, %v2000_v14  ;;  %v1329_v17 = vsel %vm1295_vm2, %v2000_v14, 0.0  ;;  %v1400_v18 = vmul.f32 %v2000_v14, %v2000_v14  ;;  %v1431_v22 = vsel %vm1295_vm2, %v1399_v13, 0.0 }
 0x10e   : > { %v1330_v20 = vadd.f32 %v1329_v17, %v1328_v16  ;;  %v1436_v33 = vsel %vm1295_vm2, %v1402_v19, 0.0 }
 0x10f   : > { %v1432_v23 = vsel %vm1295_vm2, %v1400_v18, 0.0  ;;  %v1969_v24 = vpop.f32.mrb[4].mxu0 }
 0x110   : > { %v1332_v25 = vadd.f32 %v1331_v21, %v1330_v20  ;;  %v1433_v26 = vadd.f32 %v1432_v23, %v1431_v22  ;;  %v2001_v27 = vadd.f32 %v1969_v24, %v1901_v58  ;;  %v1152_v28 = vpop.f32.mrb[5].mxu0 }
 0x111   : > { %v2002_v31 = vadd.f32 %v1152_v28, %v519_v59  ;;  %v1970_v32 = vpop.f32.mrb[6].mxu0 }
 0x112   : > { %v1435_v34 = vadd.f32 %v1434_v29, %v1433_v26  ;;  %1302 = vst.msk [vmem:[%s2348_s6 + $0x30] sm:$0xff] %vm1295_vm2, %v2001_v27  ;;  %v1334_v35 = vadd.f32 %v1333_v30, %v1332_v25  ;;  %v1155_v36 = vpop.f32.mrb[7].mxu0  ;;  %v2003_v39 = vadd.f32 %v1970_v32, %v1902_v60  ;;  %v1405_v45 = vmul.f32 %v2001_v27, %v2001_v27 }
 0x113   : > { %1300 = vst.msk [vmem:[%s2348_s6 + $0x20] sm:$0xff] %vm1295_vm2, %v2002_v31  ;;  %v1335_v37 = vsel %vm1295_vm2, %v2002_v31, 0.0  ;;  %v1403_v38 = vmul.f32 %v2002_v31, %v2002_v31  ;;  %v2004_v40 = vadd.f32 %v1155_v36, %v522_v61  ;;  %v1339_v49 = vsel %vm1295_vm2, %v2001_v27, 0.0 }
 0x114   : > { %v1336_v41 = vadd.f32 %v1335_v37, %v1334_v35  ;;  %v1437_v42 = vadd.f32 %v1436_v33, %v1435_v34  ;;  %1303 = vst.msk [vmem:[%s2348_s6 + $0x38] sm:$0xff] %vm1295_vm2, %v2003_v39  ;;  %v1406_v51 = vmul.f32 %v2003_v39, %v2003_v39  ;;  %v1341_v56 = vsel %vm1295_vm2, %v2003_v39, 0.0 }
 0x115   : > { %v1438_v43 = vsel %vm1295_vm2, %v1403_v38, 0.0  ;;  %1301 = vst.msk [vmem:[%s2348_s6 + $0x28] sm:$0xff] %vm1295_vm2, %v2004_v40  ;;  %v1337_v44 = vsel %vm1295_vm2, %v2004_v40, 0.0  ;;  %v1404_v48 = vmul.f32 %v2004_v40, %v2004_v40  ;;  %v1442_v60 = vsel %vm1295_vm2, %v1405_v45, 0.0 }
 0x116   : > { %v1439_v46 = vadd.f32 %v1438_v43, %v1437_v42  ;;  %v1338_v47 = vadd.f32 %v1337_v44, %v1336_v41 }
 0x117   : > { %v1973_v50 = vpop.f32.mrb[8].mxu0  ;;  %v1440_v53 = vsel %vm1295_vm2, %v1404_v48, 0.0 }
 0x118   : > { %v1340_v52 = vadd.f32 %v1339_v49, %v1338_v47  ;;  %v2005_v54 = vadd.f32 %v1973_v50, %v2328_v62  ;;  %v1168_v55 = vpop.f32.mrb[9].mxu0  ;;  %v1441_v57 = vadd.f32 %v1440_v53, %v1439_v46 }
 0x119   : > { %v2006_v58 = vadd.f32 %v1168_v55, %v2330_v63  ;;  %v1974_v59 = vpop.f32.mrb[10].mxu0  ;;  %v1444_v63 = vsel %vm1295_vm2, %v1406_v51, 0.0 }
 0x11a   : > { %1306 = vst.msk [vmem:[%s2348_s6 + $0x50] sm:$0xff] %vm1295_vm2, %v2005_v54  ;;  %v1342_v61 = vadd.f32 %v1341_v56, %v1340_v52  ;;  %v2007_v6 = vadd.f32 %v1974_v59, %v2332_v0  ;;  %v1171_v7 = vpop.f32.mrb[11].mxu0  ;;  %v1443_v8 = vadd.f32 %v1442_v60, %v1441_v57  ;;  %v1409_v15 = vmul.f32 %v2005_v54, %v2005_v54 }
 0x11b   : > { %1304 = vst.msk [vmem:[%s2348_s6 + $0x40] sm:$0xff] %vm1295_vm2, %v2006_v58  ;;  %v1343_v62 = vsel %vm1295_vm2, %v2006_v58, 0.0  ;;  %v1407_v9 = vmul.f32 %v2006_v58, %v2006_v58  ;;  %v2008_v10 = vadd.f32 %v1171_v7, %v2334_v1  ;;  %v1347_v17 = vsel %vm1295_vm2, %v2005_v54, 0.0 }
 0x11c   : > { %v1344_v11 = vadd.f32 %v1343_v62, %v1342_v61  ;;  %1307 = vst.msk [vmem:[%s2348_s6 + $0x58] sm:$0xff] %vm1295_vm2, %v2007_v6  ;;  %v1445_v12 = vadd.f32 %v1444_v63, %v1443_v8  ;;  %v1410_v20 = vmul.f32 %v2007_v6, %v2007_v6  ;;  %v1349_v24 = vsel %vm1295_vm2, %v2007_v6, 0.0 }
 0x11d   : > { %v1446_v13 = vsel %vm1295_vm2, %v1407_v9, 0.0  ;;  %1305 = vst.msk [vmem:[%s2348_s6 + $0x48] sm:$0xff] %vm1295_vm2, %v2008_v10  ;;  %v1345_v0 = vsel %vm1295_vm2, %v2008_v10, 0.0  ;;  %v1408_v14 = vmul.f32 %v2008_v10, %v2008_v10  ;;  %v1450_v28 = vsel %vm1295_vm2, %v1409_v15, 0.0 }
 0x11e   : > { %v1346_v16 = vadd.f32 %v1345_v0, %v1344_v11  ;;  %v1447_v18 = vadd.f32 %v1446_v13, %v1445_v12 }
 0x11f   : > { %v1448_v1 = vsel %vm1295_vm2, %v1408_v14, 0.0  ;;  %v1977_v19 = vpop.f32.mrb[12].mxu0 }
 0x120   : > { %v1348_v21 = vadd.f32 %v1347_v17, %v1346_v16  ;;  %v2009_v22 = vadd.f32 %v1977_v19, %v2336_v2  ;;  %v1184_v23 = vpop.f32.mrb[13].mxu0  ;;  %v1449_v25 = vadd.f32 %v1448_v1, %v1447_v18 }
 0x121   : > { %v2010_v26 = vadd.f32 %v1184_v23, %v2338_v3  ;;  %v1978_v27 = vpop.f32.mrb[14].mxu0  ;;  %v1452_v3 = vsel %vm1295_vm2, %v1410_v20, 0.0 }
 0x122   : > { %1310 = vst.msk [vmem:[%s2348_s6 + $0x70] sm:$0xff] %vm1295_vm2, %v2009_v22  ;;  %v1350_v29 = vadd.f32 %v1349_v24, %v1348_v21  ;;  %v2011_v30 = vadd.f32 %v1978_v27, %v2340_v4  ;;  %v1187_v31 = vpop.f32.mrb[15].mxu0  ;;  %v1451_v32 = vadd.f32 %v1450_v28, %v1449_v25  ;;  %v1413_v39 = vmul.f32 %v2009_v22, %v2009_v22 }
 0x123   : > { %1308 = vst.msk [vmem:[%s2348_s6 + $0x60] sm:$0xff] %vm1295_vm2, %v2010_v26  ;;  %v1351_v2 = vsel %vm1295_vm2, %v2010_v26, 0.0  ;;  %v1411_v33 = vmul.f32 %v2010_v26, %v2010_v26  ;;  %v2012_v34 = vadd.f32 %v1187_v31, %v2342_v5  ;;  %v1355_v42 = vsel %vm1295_vm2, %v2009_v22, 0.0 }
 0x124   : > { %v1352_v35 = vadd.f32 %v1351_v2, %v1350_v29  ;;  %1311 = vst.msk [vmem:[%s2348_s6 + $0x78] sm:$0xff] %vm1295_vm2, %v2011_v30  ;;  %v1453_v36 = vadd.f32 %v1452_v3, %v1451_v32  ;;  %v1414_v46 = vmul.f32 %v2011_v30, %v2011_v30  ;;  %v1357_v51 = vsel %vm1295_vm2, %v2011_v30, 0.0 }
 0x125   : > { %v1454_v37 = vsel %vm1295_vm2, %v1411_v33, 0.0  ;;  %1309 = vst.msk [vmem:[%s2348_s6 + $0x68] sm:$0xff] %vm1295_vm2, %v2012_v34  ;;  %v1353_v4 = vsel %vm1295_vm2, %v2012_v34, 0.0  ;;  %v1412_v38 = vmul.f32 %v2012_v34, %v2012_v34  ;;  %v1458_v56 = vsel %vm1295_vm2, %v1413_v39, 0.0 }
 0x126   : > { %v1354_v40 = vadd.f32 %v1353_v4, %v1352_v35  ;;  %v1455_v5 = vadd.f32 %v1454_v37, %v1453_v36  ;;  %v1460_v8 = vsel %vm1295_vm2, %v1414_v46, 0.0 }
 0x127   : > { %v1947_v41 = vpop.f32.mrb[16].mxu1  ;;  %v1456_v43 = vsel %vm1295_vm2, %v1412_v38, 0.0  ;;  %v1981_v44 = vpop.f32.mrb[16].mxu0 }
 0x128   : > { %v864_v45 = vpop.f32.mrb[17].mxu1  ;;  %v1356_v47 = vadd.f32 %v1355_v42, %v1354_v40  ;;  %v2013_v48 = vadd.f32 %v1981_v44, %v1947_v41  ;;  %v1200_v49 = vpop.f32.mrb[17].mxu0  ;;  %v1457_v52 = vadd.f32 %v1456_v43, %v1455_v5 }
 0x129   : > { %v1948_v50 = vpop.f32.mrb[18].mxu1  ;;  %v2014_v53 = vadd.f32 %v1200_v49, %v864_v45  ;;  %v1982_v54 = vpop.f32.mrb[18].mxu0 }
 0x12a   : > { %v867_v55 = vpop.f32.mrb[19].mxu1  ;;  %1314 = vst.msk [vmem:[%s2348_s6 + $0x90] sm:$0xff] %vm1295_vm2, %v2013_v48  ;;  %v1358_v57 = vadd.f32 %v1357_v51, %v1356_v47  ;;  %v2015_v58 = vadd.f32 %v1982_v54, %v1948_v50  ;;  %v1203_v59 = vpop.f32.mrb[19].mxu0  ;;  %v1459_v60 = vadd.f32 %v1458_v56, %v1457_v52  ;;  %v1417_v12 = vmul.f32 %v2013_v48, %v2013_v48 }
 0x12b   : > { %1312 = vst.msk [vmem:[%s2348_s6 + $0x80] sm:$0xff] %vm1295_vm2, %v2014_v53  ;;  %v1359_v61 = vsel %vm1295_vm2, %v2014_v53, 0.0  ;;  %v1415_v6 = vmul.f32 %v2014_v53, %v2014_v53  ;;  %v2016_v7 = vadd.f32 %v1203_v59, %v867_v55  ;;  %v1363_v14 = vsel %vm1295_vm2, %v2013_v48, 0.0 }
 0x12c   : > { %v1360_v62 = vadd.f32 %v1359_v61, %v1358_v57  ;;  %1315 = vst.msk [vmem:[%s2348_s6 + $0x98] sm:$0xff] %vm1295_vm2, %v2015_v58  ;;  %v1461_v9 = vadd.f32 %v1460_v8, %v1459_v60  ;;  %v1418_v1 = vmul.f32 %v2015_v58, %v2015_v58  ;;  %v1365_v23 = vsel %vm1295_vm2, %v2015_v58, 0.0 }
 0x12d   : > { %v1462_v10 = vsel %vm1295_vm2, %v1415_v6, 0.0  ;;  %1313 = vst.msk [vmem:[%s2348_s6 + $0x88] sm:$0xff] %vm1295_vm2, %v2016_v7  ;;  %v1361_v63 = vsel %vm1295_vm2, %v2016_v7, 0.0  ;;  %v1416_v11 = vmul.f32 %v2016_v7, %v2016_v7  ;;  %v1466_v28 = vsel %vm1295_vm2, %v1417_v12, 0.0 }
 0x12e   : > { %v1362_v13 = vadd.f32 %v1361_v63, %v1360_v62  ;;  %v1463_v15 = vadd.f32 %v1462_v10, %v1461_v9  ;;  %v1468_v3 = vsel %vm1295_vm2, %v1418_v1, 0.0 }
 0x12f   : > { %v1951_v0 = vpop.f32.mrb[20].mxu1  ;;  %v1464_v16 = vsel %vm1295_vm2, %v1416_v11, 0.0  ;;  %v1985_v17 = vpop.f32.mrb[20].mxu0 }
 0x130   : > { %v880_v18 = vpop.f32.mrb[21].mxu1  ;;  %v1364_v19 = vadd.f32 %v1363_v14, %v1362_v13  ;;  %v2017_v20 = vadd.f32 %v1985_v17, %v1951_v0  ;;  %v1216_v21 = vpop.f32.mrb[21].mxu0  ;;  %v1465_v24 = vadd.f32 %v1464_v16, %v1463_v15 }
 0x131   : > { %v1952_v22 = vpop.f32.mrb[22].mxu1  ;;  %v2018_v25 = vadd.f32 %v1216_v21, %v880_v18  ;;  %v1986_v26 = vpop.f32.mrb[22].mxu0 }
 0x132   : > { %v883_v27 = vpop.f32.mrb[23].mxu1  ;;  %1318 = vst.msk [vmem:[%s2348_s6 + $0xb0] sm:$0xff] %vm1295_vm2, %v2017_v20  ;;  %v1366_v29 = vadd.f32 %v1365_v23, %v1364_v19  ;;  %v2019_v30 = vadd.f32 %v1986_v26, %v1952_v22  ;;  %v1219_v31 = vpop.f32.mrb[23].mxu0  ;;  %v1467_v32 = vadd.f32 %v1466_v28, %v1465_v24  ;;  %v1421_v39 = vmul.f32 %v2017_v20, %v2017_v20 }
 0x133   : > { %1316 = vst.msk [vmem:[%s2348_s6 + $0xa0] sm:$0xff] %vm1295_vm2, %v2018_v25  ;;  %v1367_v2 = vsel %vm1295_vm2, %v2018_v25, 0.0  ;;  %v1419_v33 = vmul.f32 %v2018_v25, %v2018_v25  ;;  %v2020_v34 = vadd.f32 %v1219_v31, %v883_v27  ;;  %v1371_v42 = vsel %vm1295_vm2, %v2017_v20, 0.0 }
 0x134   : > { %v1368_v35 = vadd.f32 %v1367_v2, %v1366_v29  ;;  %1319 = vst.msk [vmem:[%s2348_s6 + $0xb8] sm:$0xff] %vm1295_vm2, %v2019_v30  ;;  %v1469_v36 = vadd.f32 %v1468_v3, %v1467_v32  ;;  %v1422_v46 = vmul.f32 %v2019_v30, %v2019_v30  ;;  %v1373_v51 = vsel %vm1295_vm2, %v2019_v30, 0.0 }
 0x135   : > { %v1470_v37 = vsel %vm1295_vm2, %v1419_v33, 0.0  ;;  %1317 = vst.msk [vmem:[%s2348_s6 + $0xa8] sm:$0xff] %vm1295_vm2, %v2020_v34  ;;  %v1369_v4 = vsel %vm1295_vm2, %v2020_v34, 0.0  ;;  %v1420_v38 = vmul.f32 %v2020_v34, %v2020_v34  ;;  %v1474_v56 = vsel %vm1295_vm2, %v1421_v39, 0.0 }
 0x136   : > { %v1370_v40 = vadd.f32 %v1369_v4, %v1368_v35  ;;  %v1471_v5 = vadd.f32 %v1470_v37, %v1469_v36  ;;  %v1476_v8 = vsel %vm1295_vm2, %v1422_v46, 0.0 }
 0x137   : > { %v1955_v41 = vpop.f32.mrb[24].mxu1  ;;  %v1472_v43 = vsel %vm1295_vm2, %v1420_v38, 0.0  ;;  %v1989_v44 = vpop.f32.mrb[24].mxu0 }
 0x138   : > { %v896_v45 = vpop.f32.mrb[25].mxu1  ;;  %v1372_v47 = vadd.f32 %v1371_v42, %v1370_v40  ;;  %v2021_v48 = vadd.f32 %v1989_v44, %v1955_v41  ;;  %v1232_v49 = vpop.f32.mrb[25].mxu0  ;;  %v1473_v52 = vadd.f32 %v1472_v43, %v1471_v5 }
 0x139   : > { %v1956_v50 = vpop.f32.mrb[26].mxu1  ;;  %v2022_v53 = vadd.f32 %v1232_v49, %v896_v45  ;;  %v1990_v54 = vpop.f32.mrb[26].mxu0 }
 0x13a   : > { %v899_v55 = vpop.f32.mrb[27].mxu1  ;;  %1322 = vst.msk [vmem:[%s2348_s6 + $0xd0] sm:$0xff] %vm1295_vm2, %v2021_v48  ;;  %v1374_v57 = vadd.f32 %v1373_v51, %v1372_v47  ;;  %v2023_v58 = vadd.f32 %v1990_v54, %v1956_v50  ;;  %v1235_v59 = vpop.f32.mrb[27].mxu0  ;;  %v1475_v60 = vadd.f32 %v1474_v56, %v1473_v52  ;;  %v1425_v12 = vmul.f32 %v2021_v48, %v2021_v48 }
 0x13b   : > { %1320 = vst.msk [vmem:[%s2348_s6 + $0xc0] sm:$0xff] %vm1295_vm2, %v2022_v53  ;;  %v1375_v61 = vsel %vm1295_vm2, %v2022_v53, 0.0  ;;  %v1423_v6 = vmul.f32 %v2022_v53, %v2022_v53  ;;  %v2024_v7 = vadd.f32 %v1235_v59, %v899_v55  ;;  %v1379_v14 = vsel %vm1295_vm2, %v2021_v48, 0.0 }
 0x13c   : > { %v1376_v62 = vadd.f32 %v1375_v61, %v1374_v57  ;;  %1323 = vst.msk [vmem:[%s2348_s6 + $0xd8] sm:$0xff] %vm1295_vm2, %v2023_v58  ;;  %v1477_v9 = vadd.f32 %v1476_v8, %v1475_v60  ;;  %v1426_v1 = vmul.f32 %v2023_v58, %v2023_v58  ;;  %v1381_v23 = vsel %vm1295_vm2, %v2023_v58, 0.0 }
 0x13d   : > { %v1478_v10 = vsel %vm1295_vm2, %v1423_v6, 0.0  ;;  %1321 = vst.msk [vmem:[%s2348_s6 + $0xc8] sm:$0xff] %vm1295_vm2, %v2024_v7  ;;  %v1377_v63 = vsel %vm1295_vm2, %v2024_v7, 0.0  ;;  %v1424_v11 = vmul.f32 %v2024_v7, %v2024_v7  ;;  %v1482_v28 = vsel %vm1295_vm2, %v1425_v12, 0.0 }
 0x13e   : > { %v1378_v13 = vadd.f32 %v1377_v63, %v1376_v62  ;;  %v1479_v15 = vadd.f32 %v1478_v10, %v1477_v9  ;;  %v1484_v35 = vsel %vm1295_vm2, %v1426_v1, 0.0 }
 0x13f   : > { %v1959_v0 = vpop.f32.mrb[28].mxu1  ;;  %v1480_v16 = vsel %vm1295_vm2, %v1424_v11, 0.0  ;;  %v1993_v17 = vpop.f32.mrb[28].mxu0 }
 0x140   : > { %v912_v18 = vpop.f32.mrb[29].mxu1  ;;  %v1380_v19 = vadd.f32 %v1379_v14, %v1378_v13  ;;  %v2025_v20 = vadd.f32 %v1993_v17, %v1959_v0  ;;  %v1248_v21 = vpop.f32.mrb[29].mxu0  ;;  %v1481_v24 = vadd.f32 %v1480_v16, %v1479_v15 }
 0x141   : > { %v1960_v22 = vpop.f32.mrb[30].mxu1  ;;  %v2026_v25 = vadd.f32 %v1248_v21, %v912_v18  ;;  %v1994_v26 = vpop.f32.mrb[30].mxu0 }
 0x142   : > { %v915_v27 = vpop.f32.mrb[31].mxu1  ;;  %1326 = vst.msk [vmem:[%s2348_s6 + $0xf0] sm:$0xff] %vm1295_vm2, %v2025_v20  ;;  %v1429_v29 = vmul.f32 %v2025_v20, %v2025_v20  ;;  %v1382_v30 = vadd.f32 %v1381_v23, %v1380_v19  ;;  %v2027_v31 = vadd.f32 %v1994_v26, %v1960_v22  ;;  %v1251_v32 = vpop.f32.mrb[31].mxu0  ;;  %v1483_v2 = vadd.f32 %v1482_v28, %v1481_v24 }
 0x143   : > { %1324 = vst.msk [vmem:[%s2348_s6 + $0xe0] sm:$0xff] %vm1295_vm2, %v2026_v25  ;;  %v1383_v33 = vsel %vm1295_vm2, %v2026_v25, 0.0  ;;  %v1427_v34 = vmul.f32 %v2026_v25, %v2026_v25  ;;  %v2028_v3 = vadd.f32 %v1251_v32, %v915_v27  ;;  %v1387_v43 = vsel %vm1295_vm2, %v2025_v20, 0.0 }
 0x144   : > { %v1490_v36 = vsel %vm1295_vm2, %v1429_v29, 0.0  ;;  %v1384_v37 = vadd.f32 %v1383_v33, %v1382_v30  ;;  %1327 = vst.msk [vmem:[%s2348_s6 + $0xf8] sm:$0xff] %vm1295_vm2, %v2027_v31  ;;  %v1430_v4 = vmul.f32 %v2027_v31, %v2027_v31  ;;  %v1485_v38 = vadd.f32 %v1484_v35, %v1483_v2 }
 0x145   : > { %v1486_v39 = vsel %vm1295_vm2, %v1427_v34, 0.0  ;;  %1325 = vst.msk [vmem:[%s2348_s6 + $0xe8] sm:$0xff] %vm1295_vm2, %v2028_v3  ;;  %v1385_v40 = vsel %vm1295_vm2, %v2028_v3, 0.0  ;;  %v1428_v41 = vmul.f32 %v2028_v3, %v2028_v3  ;;  %v1389_v47 = vsel %vm1295_vm2, %v2027_v31, 0.0 }
 0x146   : > { %v1492_v42 = vsel %vm1295_vm2, %v1430_v4, 0.0  ;;  %v1386_v5 = vadd.f32 %v1385_v40, %v1384_v37  ;;  %v1487_v44 = vadd.f32 %v1486_v39, %v1485_v38 }
 0x147   : > { %v1488_v45 = vsel %vm1295_vm2, %v1428_v41, 0.0 }
 0x148   : > { %v1388_v46 = vadd.f32 %v1387_v43, %v1386_v5  ;;  %v1489_v48 = vadd.f32 %v1488_v45, %v1487_v44 }
 0x14a   : > { %v1390_v49 = vadd.f32 %v1389_v47, %v1388_v46  ;;  %v1491_v50 = vadd.f32 %v1490_v36, %v1489_v48 }
 0x14c   : > { %v1391_v51 = vrot.slane %v1390_v49, 4  ;;  %v1493_v52 = vadd.f32 %v1492_v42, %v1491_v50 }
 0x14e   : > { %v1392_v53 = vadd.f32 %v1391_v51, %v1390_v49  ;;  %v1494_v54 = vrot.slane %v1493_v52, 4 }
 0x150   : > { %v1393_v55 = vrot.slane %v1392_v53, 2  ;;  %v1495_v56 = vadd.f32 %v1494_v54, %v1493_v52 }
 0x152   : > { %v1394_v57 = vadd.f32 %v1393_v55, %v1392_v53  ;;  %v1496_v58 = vrot.slane %v1495_v56, 2 }
 0x154   : > { %v1395_v59 = vrot.slane %v1394_v57, 1  ;;  %v1497_v60 = vadd.f32 %v1496_v58, %v1495_v56 }
 0x156   : > { %v1396_v61 = vadd.f32 %v1395_v59, %v1394_v57  ;;  %v1498_v6 = vrot.slane %v1497_v60, 1 }
 0x158   : > { %1398 = vst.msk [vmem:[%s246_s9] sm:$0x1] %vm1397_vm3, %v1396_v61  ;;  %v1499_v7 = vadd.f32 %v1498_v6, %v1497_v60 }
 0x15a   : > { %1500 = vst.msk [vmem:[%s252_s12] sm:$0x1] %vm1397_vm3, %v1499_v7 }
 0x15b PF: > { %s15_s17 = sadd.s32 1, %s2163_s17   ;;  %s2508_s15 = smov %s2159_s16 }
 0x15c   : > { %p12_p5 = scmp.ge.s32.totalorder %s15_s17, 4   ;;  %s2509_s16 = smov %s2511_s18 }
 0x15e   :  { %14 = sbr.rel (!%p12_p5) target bundleno = 2 (0x2), region = 87 }

</bundles_post_ra>
